<compile_context>
chip_gen: v7x
topology: tpu7x:2x2x1
jax: 0.10.0
libtpu: 0.0.40
codegen_flags: <defaults>
</compile_context>

<pallas_src>
import functools

import jax
import jax.numpy as jnp
from jax.experimental import pallas as pl
from jax.experimental.pallas import tpu as pltpu


def _round_up(n: int, m: int) -> int:
    return ((n + m - 1) // m) * m


# ---------------------------------------------------------------------------
# Tiny-OUT path: whole-array blocks, no grid, VPU matvec, SMEM bias.
# ---------------------------------------------------------------------------
def _fuzzy_small_kernel(bias_ref, x_ref, wt_ref, o_ref):
    # bias_ref: SMEM (OUT,) f32 ; x_ref: VMEM (B, IN) ; wt_ref: VMEM (OUT, IN)
    # o_ref:    VMEM (B, OUT).  OUT is tiny and static -> unroll in Python and
    # store each column directly (no concatenate / lane shuffles).
    x = x_ref[...].astype(jnp.float32)
    out_size = o_ref.shape[1]
    for j in range(out_size):
        w_j = wt_ref[pl.ds(j, 1), :].astype(jnp.float32)        # (1, IN) sublane row
        logit_j = jnp.sum(x * w_j, axis=-1, keepdims=True)       # VPU mul + lane reduce
        logit_j = logit_j + bias_ref[j]                          # scalar bias from SMEM
        o_ref[:, j:j + 1] = jax.nn.sigmoid(logit_j).astype(o_ref.dtype)


def _fuzzy_logic_small(x, weights, bias):
    B, _ = x.shape
    out_size = weights.shape[1]
    w_t = weights.T  # (OUT, IN): contraction dim on lanes for the VPU dot.
    return pl.pallas_call(
        _fuzzy_small_kernel,
        out_shape=jax.ShapeDtypeStruct((B, out_size), x.dtype),
        in_specs=[
            pl.BlockSpec(memory_space=pltpu.MemorySpace.SMEM),   # bias -> SMEM
            pl.BlockSpec(memory_space=pltpu.MemorySpace.VMEM),   # x
            pl.BlockSpec(memory_space=pltpu.MemorySpace.VMEM),   # w_t
        ],
        out_specs=pl.BlockSpec(memory_space=pltpu.MemorySpace.VMEM),
    )(bias.astype(jnp.float32), x, w_t)


# ---------------------------------------------------------------------------
# Tiled path, single K step: one MXU dot per output tile, no scratch, no phases.
# ---------------------------------------------------------------------------
def _fuzzy_tiled_kernel(x_ref, w_ref, b_ref, o_ref):
    logits = jnp.dot(x_ref[...], w_ref[...], preferred_element_type=jnp.float32)
    logits = logits + b_ref[...]                     # (tm, tn) + (1, tn) broadcast
    o_ref[...] = jax.nn.sigmoid(logits).astype(o_ref.dtype)


# ---------------------------------------------------------------------------
# Tiled path, K-loop fallback (only for IN too large to hold as one K tile).
# ---------------------------------------------------------------------------
def _fuzzy_tiled_k_kernel(x_ref, w_ref, b_ref, o_ref, acc_ref):
    k = pl.program_id(2)

    @pl.when(k == 0)
    def _():
        acc_ref[...] = jnp.zeros_like(acc_ref)

    acc_ref[...] += jnp.dot(
        x_ref[...], w_ref[...], preferred_element_type=jnp.float32
    )

    @pl.when(k == pl.num_programs(2) - 1)
    def _():
        o_ref[...] = jax.nn.sigmoid(acc_ref[...] + b_ref[...]).astype(o_ref.dtype)


def _fuzzy_logic_tiled(x, weights, bias, *, tm, tn, tk, compute_dtype):
    B, in_size = x.shape
    out_size = weights.shape[1]
    out_dtype = x.dtype

    # bf16 operands: MXU runs bf16 passes on f32 anyway -> halve bytes moved.
    xc = x.astype(compute_dtype)
    wc = weights.astype(compute_dtype)
    bias2d = bias.astype(jnp.float32).reshape(1, out_size)

    # ---- tile selection -----------------------------------------------------
    # tn: multiple of 128, target 256+ (v6e/v7x MXU is 256 wide).
    tn = _round_up(max(128, min(tn, _round_up(out_size, 128))), 128)
    tm = _round_up(max(8, min(tm, _round_up(B, 8))), 8)
    out_pad = _round_up(out_size, tn)
    b_pad = _round_up(B, tm)

    # Keep >= 2 output tiles so both v7x TensorCores get work (shrink tm, not tn).
    while (b_pad // tm) * (out_pad // tn) < 2 and tm > 8:
        tm = max(8, (tm // 2) // 8 * 8)
        b_pad = _round_up(B, tm)

    bpe_c = jnp.dtype(compute_dtype).itemsize
    bpe_o = jnp.dtype(out_dtype).itemsize
    budget = 36 * 1024 * 1024  # fits v7x's 64 MiB physical VMEM with headroom

    def tile_bytes(tk_, with_acc):
        b = 2 * (tm * tk_ * bpe_c + tk_ * tn * bpe_c + tm * tn * bpe_o + tn * 4)
        if with_acc:
            b += tm * tn * 4
        return b

    single_k = tile_bytes(in_size, False) <= budget and (tk is None or tk >= in_size)

    if single_k:
        k_pad = in_size
        need = tile_bytes(in_size, False)
    else:
        tk = 2048 if tk is None else tk
        tk = _round_up(max(128, min(tk, _round_up(in_size, 128))), 128)
        while tile_bytes(tk, True) > budget and tk > 128:
            tk = max(128, (tk // 2) // 128 * 128)
        k_pad = _round_up(in_size, tk)
        need = tile_bytes(tk, True)

    # Explicit VMEM limit: covers v5e's 16 MiB scoped default; stays well inside
    # v7x's 64 MiB physical VMEM.
    vmem_limit = int(min(max(need + (4 << 20), 32 << 20), 48 << 20))

    # ---- zero-padding to tile-divisible shapes (zeros don't affect the dot) --
    xp = xc
    if b_pad != B or k_pad != in_size:
        xp = jnp.pad(xc, ((0, b_pad - B), (0, k_pad - in_size)))
    wp = wc
    if k_pad != in_size or out_pad != out_size:
        wp = jnp.pad(wc, ((0, k_pad - in_size), (0, out_pad - out_size)))
    bp = bias2d
    if out_pad != out_size:
        bp = jnp.pad(bias2d, ((0, 0), (0, out_pad - out_size)))

    if single_k:
        grid = (b_pad // tm, out_pad // tn)
        out_p = pl.pallas_call(
            _fuzzy_tiled_kernel,
            out_shape=jax.ShapeDtypeStruct((b_pad, out_pad), out_dtype),
            grid_spec=pltpu.PrefetchScalarGridSpec(
                num_scalar_prefetch=0,
                grid=grid,
                in_specs=[
                    pl.BlockSpec((tm, k_pad), lambda i, j: (i, 0)),   # x tile (full K)
                    pl.BlockSpec((k_pad, tn), lambda i, j: (0, j)),   # W tile (full K)
                    pl.BlockSpec((1, tn), lambda i, j: (0, j)),       # bias tile
                ],
                out_specs=pl.BlockSpec((tm, tn), lambda i, j: (i, j)),
            ),
            compiler_params=pltpu.CompilerParams(
                dimension_semantics=("parallel", "parallel"),
                vmem_limit_bytes=vmem_limit,
            ),
        )(xp, wp, bp)
    else:
        grid = (b_pad // tm, out_pad // tn, k_pad // tk)
        out_p = pl.pallas_call(
            _fuzzy_tiled_k_kernel,
            out_shape=jax.ShapeDtypeStruct((b_pad, out_pad), out_dtype),
            grid_spec=pltpu.PrefetchScalarGridSpec(
                num_scalar_prefetch=0,
                grid=grid,
                in_specs=[
                    pl.BlockSpec((tm, tk), lambda i, j, k: (i, k)),   # x tile
                    pl.BlockSpec((tk, tn), lambda i, j, k: (k, j)),   # W tile
                    pl.BlockSpec((1, tn), lambda i, j, k: (0, j)),    # bias tile
                ],
                out_specs=pl.BlockSpec((tm, tn), lambda i, j, k: (i, j)),
                scratch_shapes=[pltpu.VMEM((tm, tn), jnp.float32)],
            ),
            compiler_params=pltpu.CompilerParams(
                dimension_semantics=("parallel", "parallel", "arbitrary"),
                vmem_limit_bytes=vmem_limit,
            ),
        )(xp, wp, bp)

    if b_pad != B or out_pad != out_size:
        out_p = out_p[:B, :out_size]
    return out_p


@functools.partial(jax.jit, static_argnames=("tm", "tn", "tk", "compute_dtype"))
def fuzzy_logic_layer(x, weights, bias, *, tm=512, tn=512, tk=None,
                      compute_dtype=jnp.bfloat16):
    """sigmoid(x @ weights + bias), matching torch.mm + bias + torch.sigmoid."""
    B, in_size = x.shape
    in_size_w, out_size = weights.shape
    assert in_size == in_size_w
    assert bias.shape == (out_size,)

    if out_size <= 16:
        # The module's actual config (output_size=1): the MXU would be <1%
        # utilised, so do the matvec on the VPU with no grid / no pipeline,
        # in f32 (bit-closer to torch than the bf16-MXU tiled path).
        return _fuzzy_logic_small(x, weights, bias)

    return _fuzzy_logic_tiled(x, weights, bias, tm=tm, tn=tn, tk=tk,
                              compute_dtype=compute_dtype)


if __name__ == "__main__":
    # ---- Module-sized check (input_size=10, output_size=1, batch=8) ----
    input_size = 10
    output_size = 1
    batch = 8

    key = jax.random.PRNGKey(0)
    kx, kw = jax.random.split(key)

    x = jax.random.normal(kx, (batch, input_size), dtype=jnp.float32)
    weights = jax.random.normal(kw, (input_size, output_size), dtype=jnp.float32)
    bias = jnp.zeros((output_size,), dtype=jnp.float32)

    out = jax.block_until_ready(fuzzy_logic_layer(x, weights, bias))
    ref = jax.nn.sigmoid(x @ weights + bias)
    assert out.shape == (batch, output_size)
    assert jnp.allclose(out, ref, atol=1e-5, rtol=1e-5)

    # ---- Tiled-path (single-K-step) smoke test at a tile-friendly size ----
    kx2, kw2, kb2 = jax.random.split(jax.random.PRNGKey(1), 3)
    B2, IN2, OUT2 = 256, 384, 256
    x2 = jax.random.normal(kx2, (B2, IN2), dtype=jnp.float32)
    w2 = jax.random.normal(kw2, (IN2, OUT2), dtype=jnp.float32) * 0.05
    b2 = jax.random.normal(kb2, (OUT2,), dtype=jnp.float32)

    out2 = jax.block_until_ready(fuzzy_logic_layer(x2, w2, b2))
    ref2 = jax.nn.sigmoid(jnp.dot(x2, w2, precision=jax.lax.Precision.HIGHEST) + b2)
    # bf16 operands (matching default MXU behaviour on f32): loose post-sigmoid tol.
    assert out2.shape == (B2, OUT2)
    assert jnp.allclose(out2, ref2, atol=2e-2, rtol=0.0)

    # ---- Non-tile-divisible shapes route through the padded tiled path ----
    kx3, kw3, kb3 = jax.random.split(jax.random.PRNGKey(2), 3)
    B3, IN3, OUT3 = 100, 70, 130
    x3 = jax.random.normal(kx3, (B3, IN3), dtype=jnp.float32)
    w3 = jax.random.normal(kw3, (IN3, OUT3), dtype=jnp.float32) * 0.1
    b3 = jax.random.normal(kb3, (OUT3,), dtype=jnp.float32)

    out3 = jax.block_until_ready(fuzzy_logic_layer(x3, w3, b3))
    ref3 = jax.nn.sigmoid(jnp.dot(x3, w3, precision=jax.lax.Precision.HIGHEST) + b3)
    assert out3.shape == (B3, OUT3)
    assert jnp.allclose(out3, ref3, atol=2e-2, rtol=0.0)

    print("KERNEL_OK")
</pallas_src>

<mosaic_0001>
module attributes {stable_mosaic.version = 11 : i64} {
  func.func @_fuzzy_small_kernel(%arg0: memref<1xf32, #tpu.memory_space<smem>>, %arg1: memref<8x10xf32, #tpu.memory_space<vmem>>, %arg2: memref<1x10xf32, #tpu.memory_space<vmem>>, %arg3: memref<8x1xf32, #tpu.memory_space<vmem>>) attributes {dimension_semantics = [], scalar_prefetch = 0 : i64, scratch_operands = 0 : i64, tpu.core_type = #tpu.core_type<tc>} {
    %c0 = arith.constant 0 : index
    %c0_0 = arith.constant 0 : index
    %0 = vector.load %arg1[%c0, %c0_0] : memref<8x10xf32, #tpu.memory_space<vmem>>, vector<8x10xf32>
    %c0_1 = arith.constant 0 : index
    %c0_2 = arith.constant 0 : index
    %1 = vector.load %arg2[%c0_1, %c0_2] : memref<1x10xf32, #tpu.memory_space<vmem>>, vector<1x10xf32>
    %2 = vector.broadcast %1 : vector<1x10xf32> to vector<8x10xf32>
    %3 = arith.mulf %0, %2 : vector<8x10xf32>
    %cst = arith.constant dense<0.000000e+00> : vector<8xf32>
    %4 = vector.multi_reduction <add>, %3, %cst [1] : vector<8x10xf32> to vector<8xf32>
    %5 = vector.shape_cast %4 : vector<8xf32> to vector<8x1xf32>
    %c0_3 = arith.constant 0 : index
    %6 = memref.load %arg0[%c0_3] : memref<1xf32, #tpu.memory_space<smem>>
    %7 = vector.broadcast %6 : f32 to vector<8x1xf32>
    %8 = arith.addf %5, %7 : vector<8x1xf32>
    %9 = arith.negf %8 : vector<8x1xf32>
    %10 = math.exp %9 : vector<8x1xf32>
    %cst_4 = arith.constant 1.000000e+00 : f32
    %11 = vector.broadcast %cst_4 : f32 to vector<8x1xf32>
    %12 = arith.addf %11, %10 : vector<8x1xf32>
    %13 = arith.divf %11, %12 : vector<8x1xf32>
    %c0_5 = arith.constant 0 : index
    %c0_6 = arith.constant 0 : index
    %14 = vector.load %arg3[%c0_5, %c0_6] : memref<8x1xf32, #tpu.memory_space<vmem>>, vector<8x1xf32>
    tpu.vector_store %arg3[%c0_5, %c0_6], %13 {strides = array<i32>} : memref<8x1xf32, #tpu.memory_space<vmem>>, vector<8x1xf32>,
    return
  }
}

</mosaic_0001>

<bundles_post_ra>
// kernel: fuzzy_logic_layer.1
= control target key start
LH: loop header
LB: loop body
LE: loop exit
PB: predicated region body
PF: predicated region fallthrough
CT: control target
= control target key end

     0   :  { %9 = vsyncpa [#allocation4], 0  ;;  %s87_s12 = smov [#allocation3]   ;;  %s129_s0 = inlined_call_operand.<no memory space> [shape: f32[1], index: 0, kind: input, shape index: {}]   ;;  %s130_s1 = inlined_call_operand.hbm [shape: f32[8,10], index: 1, kind: input, shape index: {}]   ;;  %s131_s2 = inlined_call_operand.vmem [shape: f32[1,10], index: 2, kind: input, shape index: {}]   ;;  %s132_s3 = inlined_call_operand.vmem [shape: f32[8,1], index: 3, kind: output, shape index: {}]  }
   0x1   :  { %s18_s13 = sshll.u32 %s87_s12, 4  ;;  %s63_s16 = scalar_lea.hbm %s130_s1, 128  ;;  %s19_s13 = int_to_ptr.vmem [resolvable:$true] %s18_s13 }
   0x2   :  { %p64_p0 = scmp.ne.s32.totalorder %s130_s1, %s63_s16  ;;  %p67_p1 = scmp.lt.u32.totalorder %s63_s16, %s130_s1 }
   0x4   :  { %p69_p2 = pnand %p67_p1, %p64_p0 }
   0x6   :  { %72 = shalt.err (!%p69_p2)
}
   0x7   :  { %s73_s21 = scalar_lea.vmem %s19_s13, 128  ;;  %p78_p4 = scmp.lt.s32.totalorder %s19_s13, %s19_s13 }
   0x8   :  { %p74_p3 = scmp.ne.s32.totalorder %s19_s13, %s73_s21  ;;  %p79_p5 = scmp.lt.s32.totalorder %s73_s21, %s73_s21 }
   0xa   :  { %p80_p6 = por %p79_p5, %p78_p4 }
   0xc   :  { %p81_p7 = pnand %p80_p6, %p74_p3 }
   0xe   :  { %84 = shalt.err (!%p81_p7)
}
   0xf   :  { %21 = dma.hbm_to_vmem [thread:$0]  %s130_s1, 128, %s19_s13, [#allocation4]  }
  0x10   :  { %85 = dma.done.wait [#allocation4], 128  }
  0x11   :  { %86 = vsyncadd [#allocation4], 4294967168  ;;  %v27_v0 = vld [vmem:[#allocation3] sm:$0xff]  ;;  %vm36_vm0 = vcmask 80896   ;;  %v41_v4 = vstv %s129_s0  ;;  %vm49_vm1 = vcmask 7168  }
  0x12   :  { %v56_v1 = vld [vmem:[%s131_s2] ss:$0 sm:$0xff] }
  0x13   :  { %v35_v2 = vmul.f32 %v56_v1, %v27_v0 }
  0x15   :  { %v37_v3 = vsel %vm36_vm0, %v35_v2, 0.0 }
  0x16   :  { %38 = vadd.xlane.f32.xlu0 %v37_v3 }
  0xa3   :  { %v39_v5 = vpop.xlane.xlu0 %38 }
  0xa4   :  { %v42_v6 = vadd.f32 %v41_v4, %v39_v5 }
  0xa6   :  { %v57_v7 = vmul.f32 -1.442695, %v42_v6 }
  0xa8   :  { %59 = vpow2.f32 %v57_v7 }
  0xb2   :  { %v60_v8 = vpop.eup %59 }
  0xb3   :  { %v46_v9 = vadd.f32 1.0, %v60_v8 }
  0xb5   :  { %61 = vrcp.f32 %v46_v9 }
  0xbf   :  { %v62_v10 = vpop.eup %61 }
  0xc0   :  { %50 = vst.msk [vmem:[%s132_s3] sm:$0xff] %vm49_vm1, %v62_v10 }
  0xc1   :  { %55 = vsyncpa [#allocation4], 1 }

</bundles_post_ra>
